<compile_context>
chip_gen: v5e
topology: v5e:2x2
jax: 0.10.0
libtpu: 0.0.40
codegen_flags: <defaults>
</compile_context>

<pallas_src>
import jax
import jax.numpy as jnp
from jax.experimental import pallas as pl
from jax.experimental.pallas import tpu as pltpu

LANE = 128  # TPU lane width


def _cox_pasnet_kernel(x_ref, w1_ref, b1_ref, w2_ref, b2_ref, w3_ref, w4_ref,
                       out_ref, acc_ref):
    """Grid = (batch_tiles, k_tiles); k (layer-1 reduction) is innermost."""
    k = pl.program_id(1)

    @pl.when(k == 0)
    def _init():
        acc_ref[...] = jnp.zeros_like(acc_ref)

    # Layer 1 partial product for this K tile.  Weights arrive pre-masked,
    # pre-transposed to [in, out] and already bf16 -> straight MXU feed,
    # f32 accumulation, no XLU transpose.
    acc_ref[...] += jnp.dot(x_ref[...], w1_ref[...],
                            preferred_element_type=jnp.float32)

    @pl.when(k == pl.num_programs(1) - 1)
    def _finalize():
        # Bias add + tanh in f32; only the matmul operands are bf16.
        h1 = jnp.tanh(acc_ref[...] + b1_ref[...])
        # fc1 / fc2 are folded into w2 / w3 in the wrapper (exact fold).
        h2 = jnp.tanh(jnp.dot(h1.astype(w2_ref.dtype), w2_ref[...],
                              preferred_element_type=jnp.float32)
                      + b2_ref[...])
        h3 = jnp.tanh(jnp.dot(h2.astype(w3_ref.dtype), w3_ref[...],
                              preferred_element_type=jnp.float32))
        # Final dim is padded to 128 lanes -> unmasked, lane-dense store.
        out_ref[...] = jnp.dot(h3.astype(w4_ref.dtype), w4_ref[...],
                               preferred_element_type=jnp.float32)


def _pad_axis(a, axis, multiple):
    pad = (-a.shape[axis]) % multiple
    if pad == 0:
        return a
    widths = [(0, 0)] * a.ndim
    widths[axis] = (0, pad)
    return jnp.pad(a, widths)


def cox_pasnet_forward(x, pathway_mask, w1, b1, fc1, w2, b2, fc2, w3, w4,
                       *, training=True, block_b=8, block_k=128,
                       mxu_dtype=jnp.bfloat16):
    B, In = x.shape
    P = w1.shape[0]
    H = w2.shape[0]
    Out = w3.shape[0]
    final = w4.shape[0]

    # ---- fold module math into the weights (wrapper side, f32) -------------
    w1_eff = w1 * pathway_mask                        # Layer1.weight.mul(mask)
    w2_eff = w2 * fc1[None, :] if training else w2    # (h*fc1) @ W2.T == h @ (W2*fc1).T
    w3_eff = w3 * fc2[None, :] if training else w3    # (h*fc2) @ W3.T == h @ (W3*fc2).T

    # ---- pre-transpose to [in, out]; bf16 MXU operands ----------------------
    w1t = w1_eff.T.astype(mxu_dtype)                  # [In,  P]
    w2t = w2_eff.T.astype(mxu_dtype)                  # [P,   H]
    w3t = w3_eff.T.astype(mxu_dtype)                  # [H,   Out]
    w4t = w4.T.astype(mxu_dtype)                      # [Out, final]

    # ---- pad for lane/sublane-friendly tiling -------------------------------
    final_p = ((final + LANE - 1) // LANE) * LANE     # lane-dense output slab
    w4t = _pad_axis(w4t, 1, final_p)

    x_p = _pad_axis(_pad_axis(x.astype(jnp.float32), 0, block_b), 1, block_k)
    x_p = x_p.astype(mxu_dtype)
    w1t = _pad_axis(w1t, 0, block_k)                  # zero rows: no-op in the dot
    Bp, Inp = x_p.shape

    b1r = b1.reshape(1, P).astype(jnp.float32)
    b2r = b2.reshape(1, H).astype(jnp.float32)

    grid = (Bp // block_b, Inp // block_k)

    y = pl.pallas_call(
        _cox_pasnet_kernel,
        out_shape=jax.ShapeDtypeStruct((Bp, final_p), jnp.float32),
        grid_spec=pltpu.PrefetchScalarGridSpec(
            num_scalar_prefetch=0,
            grid=grid,
            in_specs=[
                pl.BlockSpec((block_b, block_k), lambda i, k: (i, k)),  # x
                pl.BlockSpec((block_k, P),       lambda i, k: (k, 0)),  # W1^T (masked)
                pl.BlockSpec((1, P),             lambda i, k: (0, 0)),  # b1 (resident)
                pl.BlockSpec((P, H),             lambda i, k: (0, 0)),  # W2^T (resident)
                pl.BlockSpec((1, H),             lambda i, k: (0, 0)),  # b2 (resident)
                pl.BlockSpec((H, Out),           lambda i, k: (0, 0)),  # W3^T (resident)
                pl.BlockSpec((Out, final_p),     lambda i, k: (0, 0)),  # W4^T (resident)
            ],
            out_specs=pl.BlockSpec((block_b, final_p), lambda i, k: (i, 0)),
            scratch_shapes=[pltpu.VMEM((block_b, P), jnp.float32)],     # layer-1 acc
        ),
        compiler_params=pltpu.CompilerParams(
            dimension_semantics=("parallel", "arbitrary")),
    )(x_p, w1t, b1r, w2t, b2r, w3t, w4t)

    y = y[:B, :final]
    # Matches PyTorch x_pre.squeeze() (note: collapses fully if B == 1).
    return jnp.squeeze(y)


def reference_forward(x, pathway_mask, w1, b1, fc1, w2, b2, fc2, w3, w4,
                      *, training=True, mxu_dtype=jnp.bfloat16):
    """Pure-JAX reference using the same bf16-operand / f32-accumulate math."""
    w1m = w1 * pathway_mask
    h = jnp.tanh(jnp.dot(x.astype(mxu_dtype), w1m.T.astype(mxu_dtype),
                         preferred_element_type=jnp.float32) + b1)
    if training:
        h = h * fc1
    h = jnp.tanh(jnp.dot(h.astype(mxu_dtype), w2.T.astype(mxu_dtype),
                         preferred_element_type=jnp.float32) + b2)
    if training:
        h = h * fc2
    h = jnp.tanh(jnp.dot(h.astype(mxu_dtype), w3.T.astype(mxu_dtype),
                         preferred_element_type=jnp.float32))
    y = jnp.dot(h.astype(mxu_dtype), w4.T.astype(mxu_dtype),
                preferred_element_type=jnp.float32)
    return jnp.squeeze(y)


if __name__ == "__main__":
    # Small but tile-aligned shapes (lane-multiples) so the grid/pipeline and
    # lane-dense stores are actually exercised.
    B, In, P, H, Out = 16, 256, 128, 128, 128
    num_classes = 2
    final = 1 if num_classes == 2 else num_classes

    key = jax.random.PRNGKey(0)
    k = jax.random.split(key, 8)

    x = jax.random.normal(k[0], (B, In), dtype=jnp.float32)

    # Deterministic synthetic parameters (PyTorch-like uniform ranges).
    w1 = jax.random.uniform(k[1], (P, In), jnp.float32, -1.0 / In**0.5, 1.0 / In**0.5)
    b1 = jax.random.uniform(k[2], (P,),    jnp.float32, -1.0 / In**0.5, 1.0 / In**0.5)
    w2 = jax.random.uniform(k[3], (H, P),  jnp.float32, -1.0 / P**0.5,  1.0 / P**0.5)
    b2 = jax.random.uniform(k[4], (H,),    jnp.float32, -1.0 / P**0.5,  1.0 / P**0.5)
    w3 = jax.random.uniform(k[5], (Out, H), jnp.float32, -1.0 / H**0.5, 1.0 / H**0.5)
    w4 = jax.random.uniform(k[6], (final, Out), jnp.float32, -0.001, 0.001)

    # Binary pathway mask, same shape as Layer1.weight.
    pathway_mask = (jax.random.uniform(k[7], (P, In)) > 0.5).astype(jnp.float32)

    # fc1 / fc2 are ones in the module; applied since training defaults True
    # (folded exactly into W2 / W3 inside the wrapper).
    fc1 = jnp.ones((P,), jnp.float32)
    fc2 = jnp.ones((H,), jnp.float32)

    y = cox_pasnet_forward(x, pathway_mask, w1, b1, fc1, w2, b2, fc2, w3, w4)
    y = jax.block_until_ready(y)

    y_ref = reference_forward(x, pathway_mask, w1, b1, fc1, w2, b2, fc2, w3, w4)
    assert y.shape == (B,), y.shape
    assert jnp.allclose(y, y_ref, atol=1e-4, rtol=1e-4), \
        float(jnp.max(jnp.abs(y - y_ref)))

    print("KERNEL_OK")
</pallas_src>

<mosaic_0001>
module attributes {stable_mosaic.version = 11 : i64} {
  func.func @_cox_pasnet_kernel(%arg0: i32, %arg1: i32, %arg2: memref<8x128xbf16, #tpu.memory_space<vmem>>, %arg3: memref<128x128xbf16, #tpu.memory_space<vmem>>, %arg4: memref<1x128xf32, #tpu.memory_space<vmem>>, %arg5: memref<128x128xbf16, #tpu.memory_space<vmem>>, %arg6: memref<1x128xf32, #tpu.memory_space<vmem>>, %arg7: memref<128x128xbf16, #tpu.memory_space<vmem>>, %arg8: memref<128x128xbf16, #tpu.memory_space<vmem>>, %arg9: memref<8x128xf32, #tpu.memory_space<vmem>>, %arg10: memref<8x128xf32, #tpu.memory_space<vmem>>) attributes {dimension_semantics = [#tpu.dimension_semantics<parallel>, #tpu.dimension_semantics<arbitrary>], iteration_bounds = array<i64: 2, 2>, scalar_prefetch = 0 : i64, scratch_operands = 1 : i64, tpu.core_type = #tpu.core_type<tc>, window_params = [{transform_indices = @transform_0, window_bounds = array<i64: 8, 128>}, {transform_indices = @transform_1, window_bounds = array<i64: 128, 128>}, {pipeline_mode = #tpu.pipeline_mode<synchronous>, transform_indices = @transform_2, window_bounds = array<i64: 1, 128>}, {pipeline_mode = #tpu.pipeline_mode<synchronous>, transform_indices = @transform_3, window_bounds = array<i64: 128, 128>}, {pipeline_mode = #tpu.pipeline_mode<synchronous>, transform_indices = @transform_4, window_bounds = array<i64: 1, 128>}, {pipeline_mode = #tpu.pipeline_mode<synchronous>, transform_indices = @transform_5, window_bounds = array<i64: 128, 128>}, {pipeline_mode = #tpu.pipeline_mode<synchronous>, transform_indices = @transform_6, window_bounds = array<i64: 128, 128>}, {transform_indices = @transform_7, window_bounds = array<i64: 8, 128>}]} {
    %c0_i32 = arith.constant 0 : i32
    %0 = arith.cmpi eq, %arg1, %c0_i32 : i32
    %1 = arith.extui %0 : i1 to i32
    %c0_i32_0 = arith.constant 0 : i32
    %2 = arith.cmpi ne, %1, %c0_i32_0 : i32
    scf.if %2 {
      %cst_9 = arith.constant 0.000000e+00 : f32
      %12 = vector.broadcast %cst_9 : f32 to vector<8x128xf32>
      %c0_10 = arith.constant 0 : index
      %c0_11 = arith.constant 0 : index
      %13 = vector.load %arg10[%c0_10, %c0_11] : memref<8x128xf32, #tpu.memory_space<vmem>>, vector<8x128xf32>
      tpu.vector_store %arg10[%c0_10, %c0_11], %12 {strides = array<i32>} : memref<8x128xf32, #tpu.memory_space<vmem>>, vector<8x128xf32>,
    } else {
    }
    %c0 = arith.constant 0 : index
    %c0_1 = arith.constant 0 : index
    %3 = vector.load %arg10[%c0, %c0_1] : memref<8x128xf32, #tpu.memory_space<vmem>>, vector<8x128xf32>
    %c0_2 = arith.constant 0 : index
    %c0_3 = arith.constant 0 : index
    %4 = vector.load %arg2[%c0_2, %c0_3] : memref<8x128xbf16, #tpu.memory_space<vmem>>, vector<8x128xbf16>
    %c0_4 = arith.constant 0 : index
    %c0_5 = arith.constant 0 : index
    %5 = vector.load %arg3[%c0_4, %c0_5] : memref<128x128xbf16, #tpu.memory_space<vmem>>, vector<128x128xbf16>
    %cst = arith.constant dense<0.000000e+00> : vector<8x128xf32>
    %6 = tpu.matmul %4, %5, %cst {dimension_numbers = #tpu.dot_dimension_numbers<[1], [0], [0], [1], [0, 0, 1, 1], [], []>} : vector<8x128xbf16>, vector<128x128xbf16>, vector<8x128xf32> -> vector<8x128xf32>
    %7 = arith.addf %3, %6 : vector<8x128xf32>
    %c0_6 = arith.constant 0 : index
    %c0_7 = arith.constant 0 : index
    %8 = vector.load %arg10[%c0_6, %c0_7] : memref<8x128xf32, #tpu.memory_space<vmem>>, vector<8x128xf32>
    tpu.vector_store %arg10[%c0_6, %c0_7], %7 {strides = array<i32>} : memref<8x128xf32, #tpu.memory_space<vmem>>, vector<8x128xf32>,
    %c1_i32 = arith.constant 1 : i32
    %9 = arith.cmpi eq, %arg1, %c1_i32 : i32
    %10 = arith.extui %9 : i1 to i32
    %c0_i32_8 = arith.constant 0 : i32
    %11 = arith.cmpi ne, %10, %c0_i32_8 : i32
    scf.if %11 {
      %c0_9 = arith.constant 0 : index
      %c0_10 = arith.constant 0 : index
      %12 = vector.load %arg10[%c0_9, %c0_10] : memref<8x128xf32, #tpu.memory_space<vmem>>, vector<8x128xf32>
      %c0_11 = arith.constant 0 : index
      %c0_12 = arith.constant 0 : index
      %13 = vector.load %arg4[%c0_11, %c0_12] : memref<1x128xf32, #tpu.memory_space<vmem>>, vector<1x128xf32>
      %14 = vector.broadcast %13 : vector<1x128xf32> to vector<8x128xf32>
      %15 = arith.addf %12, %14 : vector<8x128xf32>
      %16 = math.tanh %15 : vector<8x128xf32>
      %17 = arith.truncf %16 : vector<8x128xf32> to vector<8x128xbf16>
      %c0_13 = arith.constant 0 : index
      %c0_14 = arith.constant 0 : index
      %18 = vector.load %arg5[%c0_13, %c0_14] : memref<128x128xbf16, #tpu.memory_space<vmem>>, vector<128x128xbf16>
      %cst_15 = arith.constant dense<0.000000e+00> : vector<8x128xf32>
      %19 = tpu.matmul %17, %18, %cst_15 {dimension_numbers = #tpu.dot_dimension_numbers<[1], [0], [0], [1], [0, 0, 1, 1], [], []>} : vector<8x128xbf16>, vector<128x128xbf16>, vector<8x128xf32> -> vector<8x128xf32>
      %c0_16 = arith.constant 0 : index
      %c0_17 = arith.constant 0 : index
      %20 = vector.load %arg6[%c0_16, %c0_17] : memref<1x128xf32, #tpu.memory_space<vmem>>, vector<1x128xf32>
      %21 = vector.broadcast %20 : vector<1x128xf32> to vector<8x128xf32>
      %22 = arith.addf %19, %21 : vector<8x128xf32>
      %23 = math.tanh %22 : vector<8x128xf32>
      %24 = arith.truncf %23 : vector<8x128xf32> to vector<8x128xbf16>
      %c0_18 = arith.constant 0 : index
      %c0_19 = arith.constant 0 : index
      %25 = vector.load %arg7[%c0_18, %c0_19] : memref<128x128xbf16, #tpu.memory_space<vmem>>, vector<128x128xbf16>
      %cst_20 = arith.constant dense<0.000000e+00> : vector<8x128xf32>
      %26 = tpu.matmul %24, %25, %cst_20 {dimension_numbers = #tpu.dot_dimension_numbers<[1], [0], [0], [1], [0, 0, 1, 1], [], []>} : vector<8x128xbf16>, vector<128x128xbf16>, vector<8x128xf32> -> vector<8x128xf32>
      %27 = math.tanh %26 : vector<8x128xf32>
      %28 = arith.truncf %27 : vector<8x128xf32> to vector<8x128xbf16>
      %c0_21 = arith.constant 0 : index
      %c0_22 = arith.constant 0 : index
      %29 = vector.load %arg8[%c0_21, %c0_22] : memref<128x128xbf16, #tpu.memory_space<vmem>>, vector<128x128xbf16>
      %cst_23 = arith.constant dense<0.000000e+00> : vector<8x128xf32>
      %30 = tpu.matmul %28, %29, %cst_23 {dimension_numbers = #tpu.dot_dimension_numbers<[1], [0], [0], [1], [0, 0, 1, 1], [], []>} : vector<8x128xbf16>, vector<128x128xbf16>, vector<8x128xf32> -> vector<8x128xf32>
      %c0_24 = arith.constant 0 : index
      %c0_25 = arith.constant 0 : index
      %31 = vector.load %arg9[%c0_24, %c0_25] : memref<8x128xf32, #tpu.memory_space<vmem>>, vector<8x128xf32>
      tpu.vector_store %arg9[%c0_24, %c0_25], %30 {strides = array<i32>} : memref<8x128xf32, #tpu.memory_space<vmem>>, vector<8x128xf32>,
    } else {
    }
    return
  }
  func.func @transform_0(%arg0: i32, %arg1: i32) -> (i32, i32) {
    %c0_i32 = arith.constant 0 : i32
    return %arg0, %arg1 : i32, i32
  }
  func.func @transform_1(%arg0: i32, %arg1: i32) -> (i32, i32) {
    %c0_i32 = arith.constant 0 : i32
    %c0_i32_0 = arith.constant 0 : i32
    return %arg1, %c0_i32 : i32, i32
  }
  func.func @transform_2(%arg0: i32, %arg1: i32) -> (i32, i32) {
    %c0_i32 = arith.constant 0 : i32
    %c0_i32_0 = arith.constant 0 : i32
    %c0_i32_1 = arith.constant 0 : i32
    return %c0_i32, %c0_i32_0 : i32, i32
  }
  func.func @transform_3(%arg0: i32, %arg1: i32) -> (i32, i32) {
    %c0_i32 = arith.constant 0 : i32
    %c0_i32_0 = arith.constant 0 : i32
    %c0_i32_1 = arith.constant 0 : i32
    return %c0_i32, %c0_i32_0 : i32, i32
  }
  func.func @transform_4(%arg0: i32, %arg1: i32) -> (i32, i32) {
    %c0_i32 = arith.constant 0 : i32
    %c0_i32_0 = arith.constant 0 : i32
    %c0_i32_1 = arith.constant 0 : i32
    return %c0_i32, %c0_i32_0 : i32, i32
  }
  func.func @transform_5(%arg0: i32, %arg1: i32) -> (i32, i32) {
    %c0_i32 = arith.constant 0 : i32
    %c0_i32_0 = arith.constant 0 : i32
    %c0_i32_1 = arith.constant 0 : i32
    return %c0_i32, %c0_i32_0 : i32, i32
  }
  func.func @transform_6(%arg0: i32, %arg1: i32) -> (i32, i32) {
    %c0_i32 = arith.constant 0 : i32
    %c0_i32_0 = arith.constant 0 : i32
    %c0_i32_1 = arith.constant 0 : i32
    return %c0_i32, %c0_i32_0 : i32, i32
  }
  func.func @transform_7(%arg0: i32, %arg1: i32) -> (i32, i32) {
    %c0_i32 = arith.constant 0 : i32
    %c0_i32_0 = arith.constant 0 : i32
    return %arg0, %c0_i32 : i32, i32
  }
}

</mosaic_0001>

<bundles_post_ra>
// kernel: tpu_custom_call.1
= control target key start
LH: loop header
LB: loop body
LE: loop exit
PB: predicated region body
PF: predicated region fallthrough
CT: control target
= control target key end

     0   :  { %s1936_s0 = inlined_call_operand.hbm [shape: bf16[16,256], index: 0, kind: input, shape index: {}]   ;;  %s1937_s1 = inlined_call_operand.hbm [shape: bf16[256,128], index: 1, kind: input, shape index: {}]   ;;  %s1938_s2 = inlined_call_operand.vmem [shape: f32[1,128], index: 2, kind: input, shape index: {}]   ;;  %s1939_s3 = inlined_call_operand.hbm [shape: bf16[128,128], index: 3, kind: input, shape index: {}]   ;;  %s1940_s4 = inlined_call_operand.vmem [shape: f32[1,128], index: 4, kind: input, shape index: {}]   ;;  %s1941_s5 = inlined_call_operand.hbm [shape: bf16[128,128], index: 5, kind: input, shape index: {}]   ;;  %s1942_s6 = inlined_call_operand.hbm [shape: bf16[128,128], index: 6, kind: input, shape index: {}]   ;;  %s1943_s7 = inlined_call_operand.hbm [shape: f32[16,128], index: 7, kind: output, shape index: {}]  }
   0x1   :  { %1956 = sst [smem:[#allocation30_spill]] %s1936_s0 }
   0x2   :  { %1957 = sst [smem:[#allocation31_spill]] %s1939_s3 }
   0x3   :  { %1958 = sst [smem:[#allocation32_spill]] %s1940_s4 }
   0x4   :  { %1959 = sst [smem:[#allocation33_spill]] %s1941_s5 }
   0x5   :  { %1960 = sst [smem:[#allocation34_spill]] %s1942_s6 }
   0x6   :  { %1961 = sst [smem:[#allocation35_spill]] %s1943_s7 }
   0x7   :  { %12 = vsyncpa [#allocation4], 0 }
   0x8   :  { %14 = vsyncpa [#allocation4 + $0x1], 0 }
   0x9   :  { %15 = vsyncpa [#allocation7], 0 }
   0xa   :  { %17 = vsyncpa [#allocation7 + $0x1], 0 }
   0xb   :  { %18 = vsyncpa [#allocation10], 0 }
   0xc   :  { %19 = vsyncpa [#allocation5], 0 }
   0xd   :  { %21 = vsyncpa [#allocation5 + $0x1], 0  ;;  %s1608_s24 = smov 0   ;;  %s1610_s25 = smov 0  }
   0xe   :  { %s1612_s26 = smov 0   ;;  %s1614_s27 = smov 0  }
   0xf   :  { %s1616_s28 = smov 0   ;;  %s1618_s29 = smov 0  }
  0x10   :  { %s1620_s30 = smov 0   ;;  %s1622_s8 = smov 0  }
  0x11   :  { %s1624_s9 = smov 0   ;;  %s1626_s10 = smov 0  }
  0x12   :  { %s1628_s11 = smov 0   ;;  %s1630_s12 = smov 0  }
  0x13   :  { %s1632_s13 = smov 0   ;;  %s1634_s14 = smov 0  }
  0x14 LB: > { %1962 = sst [smem:[#allocation18_spill]] %s1508_s24  ;;  %s1679_s15 = sadd.s32 4294967295, %s1560_s14   ;;  %s1560_s14 = sphi %s1634_s14, %s27_s14   ;;  %s1556_s13 = sphi %s1632_s13, %s2004_s13   ;;  %s1552_s12 = sphi %s1630_s12, %s2014_s12   ;;  %s1548_s11 = sphi %s1628_s11, %s2013_s11   ;;  %s1544_s10 = sphi %s1626_s10, %s2012_s10   ;;  %s1540_s9 = sphi %s1624_s9, %s2001_s9   ;;  %s1536_s8 = sphi %s1622_s8, %s2011_s8   ;;  %s1532_s30 = sphi %s1620_s30, %s2010_s30   ;;  %s1528_s29 = sphi %s1618_s29, %s2009_s29   ;;  %s1524_s28 = sphi %s1616_s28, %s2008_s28   ;;  %s1520_s27 = sphi %s1614_s27, %s2007_s27   ;;  %s1516_s26 = sphi %s1612_s26, %s1998_s26   ;;  %s1512_s25 = sphi %s1610_s25, %s2006_s25   ;;  %s1508_s24 = sphi %s1608_s24, %s2005_s24  }
  0x15   : > { %1963 = sst [smem:[#allocation19_spill]] %s1516_s26  ;;  %p894_p0 = scmp.ge.s32.totalorder %s1560_s14, 1 }
  0x16   : > { %1964 = sst [smem:[#allocation20_spill]] %s1540_s9  ;;  %p62_p1 = scmp.eq.s32.totalorder %s1679_s15, 0 }
  0x17   : > { %1965 = sst [smem:[#allocation21_spill]] %s1548_s11  ;;  %p216_p2 = scmp.eq.s32.totalorder %s1679_s15, 3 }
  0x18   : > { %1966 = sst [smem:[#allocation22_spill]] %s1556_s13  ;;  %p229_p3 = scmp.lt.s32.totalorder %s1560_s14, 5 }
  0x19   : > { %s1967_s3 = sld [smem:[#allocation31_spill]]  ;;  %s1562_s20 = smov [#allocation8]  }
  0x1a   : > { %p1688_p4 = pnand %p894_p0, %p229_p3  ;;  %s245_s21 = sshll.u32 %s1562_s20, 4  ;;  %s246_s21 = int_to_ptr.vmem [resolvable:$true] %s245_s21 }
  0x1b   : > { %s1970_s5 = sld [smem:[#allocation33_spill]]  ;;  %s1563_s17 = smov [#allocation9]  }
  0x1c   : > { %p1097_p5 = pneg %p1688_p4  ;;  %s262_s20 = sshll.u32 %s1563_s17, 4  ;;  %s263_s20 = int_to_ptr.vmem [resolvable:$true] %s262_s20 }
  0x1d   : > { %s1946_s11 = smov 4   ;;  %s1971_s6 = sld [smem:[#allocation34_spill]] }
  0x1e   : > { %p1696_p6 = pnand %p1097_p5, %p62_p1  ;;  %s1566_s17 = smov [#allocation11]  }
  0x1f   : > { %s243_s18 = sshll.u32 %s1967_s3, 4  ;;  %s1945_s3 = smov 64   ;;  %s244_s18 = int_to_ptr.hbm [resolvable:$true] %s243_s18 }
  0x20   : > { %1100 = dma.hbm_to_vmem [thread:$0]  (!%p1696_p6), %s244_s18, 1024, %s246_s21, [#allocation7], %s1945_s3, %s1945_s3, %s1946_s11  }
  0x21   : > { %s260_s16 = sshll.u32 %s1970_s5, 4  ;;  %s276_s4 = sshll.u32 %s1566_s17, 4  ;;  %s261_s16 = int_to_ptr.hbm [resolvable:$true] %s260_s16  ;;  %s277_s4 = int_to_ptr.vmem [resolvable:$true] %s276_s4 }
  0x22   : > { %1103 = dma.hbm_to_vmem [thread:$0]  (!%p1696_p6), %s261_s16, 1024, %s263_s20, [#allocation10], %s1945_s3, %s1945_s3, %s1946_s11  }
  0x23   : > { %s274_s5 = sshll.u32 %s1971_s6, 4  ;;  %s36_s21 = sadd.s32 1, %s1552_s12  ;;  %s275_s5 = int_to_ptr.hbm [resolvable:$true] %s274_s5 }
  0x24   : > { %1106 = dma.hbm_to_vmem [thread:$0]  (!%p1696_p6), %s275_s5, 1024, %s277_s4, [#allocation10], %s1945_s3, %s1945_s3, %s1946_s11  }
  0x25   : > { %p37_p7 = scmp.ge.s32.totalorder %s36_s21, 2  ;;  %s39_s16 = sadd.s32 1, %s1556_s13 }
  0x26   : > { %s48_s20 = sadd.s32 1, %s1540_s9  ;;  %p55_p8 = scmp.ne.s32.totalorder %s1540_s9, %s1536_s8 }
  0x27   : > { %s2016_s21 = smov (%p37_p7, %s36_s21), 0  ;;  %s2018_s16 = smov (!%p37_p7, %s39_s16), %s1556_s13 }
  0x28   : > { %1972 = sst [smem:[#allocation23_spill]] %s2016_s21  ;;  %s44_s4 = ssub.s32 %s1552_s12, %s2016_s21 }
  0x29   : > { %p56_p9 = scmp.eq.s32.totalorder %s1560_s14, 0  ;;  %p41_p10 = scmp.ge.s32.totalorder %s2018_s16, 2 }
  0x2a   : > { %p61_p11 = scmp.ne.s32.totalorder %s1536_s8, %s1532_s30  ;;  %p72_p13 = scmp.eq.s32.totalorder %s44_s4, 0 }
  0x2b   : > { %p1737_p12 = por %p56_p9, %p55_p8  ;;  %s2020_s16 = smov (%p41_p10, %s2018_s16), 0 }
  0x2c   : > { %1974 = sst [smem:[#allocation24_spill]] %s2020_s16  ;;  %p1745_p0 = por %p62_p1, %p61_p11 }
  0x2d   : > { %s74_s30 = sadd.s32 1, %s1528_s29  ;;  %s43_s7 = ssub.s32 %s1556_s13, %s2020_s16 }
  0x2e   : > { %p81_p3 = scmp.ne.s32.totalorder %s1528_s29, %s1524_s28  ;;  %s45_s23 = sor.u32 %s44_s4, %s43_s7 }
  0x2f   : > { %p87_p5 = scmp.ne.s32.totalorder %s1524_s28, %s1520_s27  ;;  %p46_p6 = scmp.eq.s32.totalorder %s45_s23, 0 }
  0x30   : > { %p1758_p7 = por %p81_p3, %p56_p9  ;;  %p203_p10 = scmp.eq.s32.totalorder %s43_s7, 0 }
  0x31   : > { %s1763_s3 = scalar_select %p72_p13, %s1528_s29, %s74_s30  }
  0x32   : > { %s1766_s11 = scalar_select %p46_p6, %s1540_s9, %s48_s20  }
  0x33   : > { %1977 = sst [smem:[#allocation25_spill]] %s1763_s3  ;;  %p1770_p8 = por %p87_p5, %p62_p1 }
  0x34   : > { %1978 = sst [smem:[#allocation26_spill]] %s1766_s11  ;;  %s205_s4 = sadd.s32 1, %s1516_s26 }
  0x35   : > { %p215_p11 = scmp.ne.s32.totalorder %s1516_s26, %s1512_s25  ;;  %p221_p13 = scmp.ne.s32.totalorder %s1512_s25, %s1508_s24 }
  0x36   : > { %s1778_s27 = scalar_select %p203_p10, %s1516_s26, %s205_s4  }
  0x37   : > { %p1782_p9 = por %p216_p2, %p215_p11  ;;  %s1983_s20 = sadd.s32 4294967294, %s1560_s14  }
  0x38   : > { %1980 = sst [smem:[#allocation27_spill]] %s1778_s27  ;;  %p222_p3 = scmp.eq.s32.totalorder %s1983_s20, 3 }
  0x39   : > { %s1981_s23 = scalar_select %p1782_p9, 1, 0 }
  0x3a   : > { %p1121_p5 = scmp.lt.s32.totalorder %s1560_s14, 4  ;;  %s290_s30 = sand.u32 1, %s1540_s9  }
  0x3b   : > { %1982 = sst [smem:[#allocation28_spill]] %s1981_s23  ;;  %s900_s7 = sshll.u32 %s1556_s13, 1 }
  0x3c   : > { %p1793_p6 = por %p222_p3, %p221_p13  ;;  %s899_s6 = sshll.u32 %s290_s30, 2 }
  0x3d   : > { %s298_s16 = sadd.s32 %s1552_s12, %s900_s7  ;;  %s1986_s0 = sld [smem:[#allocation30_spill]] }
  0x3e   : > { %s1984_s4 = scalar_select %p1793_p6, 1, 0 }
  0x3f   : > { %s901_s21 = sshll.u32 %s298_s16, 2  ;;  %s294_s26 = scalar_lea.vmem [#allocation3], %s899_s6 }
  0x40   : > { %1985 = sst [smem:[#allocation29_spill]] %s1984_s4  ;;  %s304_s24 = sshll.u32 %s294_s26, 4  ;;  %s305_s24 = int_to_ptr.vmem [resolvable:$true] %s304_s24 }
  0x41   : > { %p1108_p2 = pnand %p1121_p5, %p1737_p12  ;;  %p1809_p10 = pnand %p1121_p5, %p1758_p7 }
  0x42   : > { %s311_s16 = sand.u32 1, %s1560_s14   ;;  %s291_s7 = scalar_lea.sflag [#allocation4], %s290_s30 }
  0x43   : > { %s300_s27 = scalar_lea.hbm %s1986_s0, %s901_s21  ;;  %s313_s3 = sand.u32 1, %s1528_s29  }
  0x44   : > { %s302_s20 = sshll.u32 %s300_s27, 4  ;;  %s902_s11 = sshll.u32 %s313_s3, 6  ;;  %s303_s20 = int_to_ptr.hbm [resolvable:$true] %s302_s20 }
  0x45   : > { %1110 = dma.hbm_to_vmem [thread:$0]  (!%p1108_p2), %s303_s20, 64, %s305_s24, %s291_s7  }
  0x46   : > { %s1046_s6 = sshll.u32 %s1552_s12, 6  ;;  %s315_s0 = scalar_lea.vmem [#allocation6], %s902_s11 }
  0x47   : > { %s320_s27 = scalar_lea.hbm %s1937_s1, %s1046_s6  ;;  %s323_s9 = sshll.u32 %s315_s0, 4  ;;  %s324_s9 = int_to_ptr.vmem [resolvable:$true] %s323_s9 }
  0x48   : > { %s321_s5 = sshll.u32 %s320_s27, 4  ;;  %s312_s17 = scalar_lea.sflag [#allocation7], %s311_s16  ;;  %s322_s5 = int_to_ptr.hbm [resolvable:$true] %s321_s5 }
  0x49   : > { %s1988_s4 = smov 4   ;;  %s1989_s23 = smov 64  }
  0x4a   : > { %1113 = dma.hbm_to_vmem [thread:$0]  (!%p1809_p10), %s322_s5, 1024, %s324_s9, %s312_s17, %s1989_s23, %s1989_s23, %s1988_s4  }
  0x4b   : > { %335 = sbr.rel (%p1688_p4) target bundleno = 729 (0x2d9), region = 48  ;;  %s337_s24 = sand.u32 (!%p1688_p4), 1, %s1536_s8  }
  0x4c   : > { %s1827_s30 = sshll.u32 (!%p1688_p4), %s337_s24, 2  ;;  %s338_s20 = scalar_lea.sflag (!%p1688_p4), [#allocation4], %s337_s24 }
  0x4d   : > { %s341_s7 = scalar_lea.vmem (!%p1688_p4), [#allocation3], %s1827_s30 }
  0x50   : > { %1487 = dma.done.wait (%p1745_p0), %s338_s20, 64  }
  0x51   : > { %1489 = vsyncadd (%p1745_p0), %s338_s20, 4294967232  ;;  %s347_s0 = sand.u32 1, %s1679_s15   ;;  %s349_s9 = sand.u32 1, %s1524_s28  }
  0x52   : > { %s907_s13 = sshll.u32 %s349_s9, 6  ;;  %s348_s19 = scalar_lea.sflag [#allocation7], %s347_s0 }
  0x53   : > { %s351_s23 = scalar_lea.vmem [#allocation6], %s907_s13 }
  0x54   : > { %1491 = dma.done.wait (%p1770_p8), %s348_s19, 1024  }
  0x55   : > { %1493 = vsyncadd (%p1770_p8), %s348_s19, 4294966272 }
  0x56   : > { %1495 = dma.done.wait (%p62_p1), [#allocation7], 1024  }
  0x57   : > { %1497 = vsyncadd (%p62_p1), [#allocation7], 4294966272 }
  0x58   : > { %1499 = dma.done.wait (%p62_p1), [#allocation10], 2048  }
  0x59   : > { %1501 = vsyncadd (%p62_p1), [#allocation10], 4294965248  ;;  %s400_s22 = sand.u32 1, %s1512_s25   ;;  %p912_p4 = scmp.ne.s32.totalorder %s1544_s10, 0 }
  0x5a   : > { %s1851_s4 = sshll.u32 %s400_s22, 3 }
  0x5b   : > { %s402_s18 = scalar_lea.vmem [#allocation12], %s1851_s4  ;;  %407 = sbr.rel (%p912_p4) target bundleno = 98 (0x62), region = 72 }
  0x60   : > { %v1567_v0 = vmov 0.0  }
  0x61   : > { %408 = vst [vmem:[#allocation2] sm:$0xff] %v1567_v0 }
  0x62 PF: > { %v1054_v1 = vld [vmem:[%s351_s23 + $0x38] sm:$0xff]  ;;  %v1053_v2 = vld [vmem:[%s351_s23 + $0x30] sm:$0xff]  ;;  %v1052_v3 = vld [vmem:[%s351_s23 + $0x28] sm:$0xff]  ;;  %p945_p1 = scmp.ne.s32.totalorder %s1544_s10, 1 }
  0x63   : > { %475 = vmatpush.bf16.msra.mxu0 %v1054_v1  ;;  %v1051_v4 = vld [vmem:[%s351_s23 + $0x20] sm:$0xff]  ;;  %v1050_v5 = vld [vmem:[%s351_s23 + $0x18] sm:$0xff]  ;;  %v1049_v6 = vld [vmem:[%s351_s23 + $0x10] sm:$0xff]  ;;  %s1990_s11 = sld [smem:[#allocation32_spill]] (!%p945_p1) }
  0x64   : > { %v1048_v7 = vld [vmem:[%s351_s23 + $0x8] sm:$0xff]  ;;  %v1047_v8 = vld [vmem:[%s351_s23] sm:$0xff]  ;;  %v410_v9 = vld [vmem:[%s341_s7] sm:$0xf] }
  0x67   : > { %476 = vmatpush.bf16.msra.mxu0 %v1053_v2 }
  0x68   : > { %v409_v10 = vld [vmem:[#allocation2] sm:$0xff] }
  0x6b   : > { %477 = vmatpush.bf16.msra.mxu0 %v1052_v3 }
  0x6f   : > { %478 = vmatpush.bf16.msra.mxu0 %v1051_v4 }
  0x73   : > { %479 = vmatpush.bf16.msra.mxu0 %v1050_v5 }
  0x77   : > { %480 = vmatpush.bf16.msra.mxu0 %v1049_v6 }
  0x7b   : > { %481 = vmatpush.bf16.msra.mxu0 %v1048_v7 }
  0x7f   : > { %482 = vmatpush.bf16.msra.mxu0 %v1047_v8 }
  0x82   : > { %483 = vmatmul.bf16.vlgmr.msra.gmra.mxu0 %v410_v9 }
  0xff   : > { %v484_v11 = vpop.f32.mrf.mxu0 }
 0x100   : > { %v488_v12 = vadd.f32 %v484_v11, %v409_v10 }
 0x102   : > { %489 = vst [vmem:[#allocation2] sm:$0xff] %v488_v12 }
 0x103   : > { %493 = sbr.rel (%p945_p1) target bundleno = 708 (0x2c4), region = 76 }
 0x107   : > { %v486_v13 = vpop.f32.mrf.mxu0 }
 0x108   : > { %v1062_v14 = vld [vmem:[#allocation8 + $0x38] sm:$0xff]  ;;  %v1061_v15 = vld [vmem:[#allocation8 + $0x30] sm:$0xff]  ;;  %v1060_v18 = vld [vmem:[#allocation8 + $0x28] sm:$0xff] }
 0x109   : > { %570 = vmatpush.bf16.msra.mxu0 %v1062_v14  ;;  %v1070_v16 = vld [vmem:[#allocation9 + $0x38] sm:$0xff]  ;;  %v1069_v17 = vld [vmem:[#allocation9 + $0x30] sm:$0xff]  ;;  %v1068_v19 = vld [vmem:[#allocation9 + $0x28] sm:$0xff] }
 0x10a   : > { %649 = vmatpush.bf16.msra.mxu1 %v1070_v16  ;;  %v1059_v20 = vld [vmem:[#allocation8 + $0x20] sm:$0xff]  ;;  %v1244_v21 = vld [vmem:[%s1938_s2] ss:$0 sm:$0xff]  ;;  %v1058_v24 = vld [vmem:[#allocation8 + $0x18] sm:$0xff] }
 0x10b   : > { %v494_v22 = vld [vmem:[#allocation2] sm:$0xff]  ;;  %v1067_v23 = vld [vmem:[#allocation9 + $0x20] sm:$0xff]  ;;  %v1066_v26 = vld [vmem:[#allocation9 + $0x18] sm:$0xff] }
 0x10c   : > { %v499_v25 = vadd.f32 %v1244_v21, %v494_v22  ;;  %v1057_v27 = vld [vmem:[#allocation8 + $0x10] sm:$0xff]  ;;  %v1056_v28 = vld [vmem:[#allocation8 + $0x8] sm:$0xff]  ;;  %v1055_v30 = vld [vmem:[#allocation8] sm:$0xff] }
 0x10d   : > { %571 = vmatpush.bf16.msra.mxu0 %v1061_v15  ;;  %v1065_v32 = vld [vmem:[#allocation9 + $0x10] sm:$0xff]  ;;  %v1064_v33 = vld [vmem:[#allocation9 + $0x8] sm:$0xff]  ;;  %v1063_v34 = vld [vmem:[#allocation9] sm:$0xff] }
 0x10e   : > { %650 = vmatpush.bf16.msra.mxu1 %v1069_v17  ;;  %1246 = vtanh.f32 %v499_v25  ;;  %v1078_v35 = vld [vmem:[#allocation11 + $0x38] sm:$0xff]  ;;  %v1077_v36 = vld [vmem:[#allocation11 + $0x30] sm:$0xff]  ;;  %v1076_v37 = vld [vmem:[#allocation11 + $0x28] sm:$0xff] }
 0x10f   : > { %728 = vmatpush.bf16.msra.mxu2 %v1078_v35  ;;  %v1075_v38 = vld [vmem:[#allocation11 + $0x20] sm:$0xff]  ;;  %v1074_v39 = vld [vmem:[#allocation11 + $0x18] sm:$0xff]  ;;  %v1245_v40 = vld [vmem:[%s1990_s11] ss:$0 sm:$0xff] }
 0x110   : > { %v1073_v41 = vld [vmem:[#allocation11 + $0x10] sm:$0xff]  ;;  %v1072_v47 = vld [vmem:[#allocation11 + $0x8] sm:$0xff]  ;;  %v1071_v48 = vld [vmem:[#allocation11] sm:$0xff] }
 0x111   : > { %572 = vmatpush.bf16.msra.mxu0 %v1060_v18 }
 0x112   : > { %651 = vmatpush.bf16.msra.mxu1 %v1068_v19 }
 0x113   : > { %729 = vmatpush.bf16.msra.mxu2 %v1077_v36 }
 0x114   : > { %v1247_v29 = vpop.eup %1246 }
 0x115   : > { %573 = vmatpush.bf16.msra.mxu0 %v1059_v20  ;;  %v501_v31 = vpack.c.bf16 %v1247_v29, %v1247_v29 }
 0x116   : > { %652 = vmatpush.bf16.msra.mxu1 %v1067_v23 }
 0x117   : > { %730 = vmatpush.bf16.msra.mxu2 %v1076_v37 }
 0x119   : > { %574 = vmatpush.bf16.msra.mxu0 %v1058_v24 }
 0x11a   : > { %653 = vmatpush.bf16.msra.mxu1 %v1066_v26 }
 0x11b   : > { %731 = vmatpush.bf16.msra.mxu2 %v1075_v38 }
 0x11d   : > { %575 = vmatpush.bf16.msra.mxu0 %v1057_v27 }
 0x11e   : > { %654 = vmatpush.bf16.msra.mxu1 %v1065_v32 }
 0x11f   : > { %732 = vmatpush.bf16.msra.mxu2 %v1074_v39 }
 0x121   : > { %576 = vmatpush.bf16.msra.mxu0 %v1056_v28 }
 0x122   : > { %655 = vmatpush.bf16.msra.mxu1 %v1064_v33 }
 0x123   : > { %733 = vmatpush.bf16.msra.mxu2 %v1073_v41 }
 0x125   : > { %577 = vmatpush.bf16.msra.mxu0 %v1055_v30 }
 0x126   : > { %656 = vmatpush.bf16.msra.mxu1 %v1063_v34 }
 0x127   : > { %734 = vmatpush.bf16.msra.mxu2 %v1072_v47 }
 0x128   : > { %578 = vmatmul.bf16.vlgmr.msra.gmra.mxu0 %v501_v31 }
 0x12b   : > { %735 = vmatpush.bf16.msra.mxu2 %v1071_v48 }
 0x1a5   : > { %v579_v42 = vpop.f32.mrf.mxu0 }
 0x1a6   : > { %v580_v43 = vadd.f32 %v1245_v40, %v579_v42 }
 0x1a8   : > { %1248 = vtanh.f32 %v580_v43 }
 0x1ad   : > { %v581_v44 = vpop.f32.mrf.mxu0 }
 0x1ae   : > { %v1249_v45 = vpop.eup %1248 }
 0x1af   : > { %v584_v46 = vpack.c.bf16 %v1249_v45, %v1249_v45 }
 0x1b1   : > { %657 = vmatmul.bf16.vlgmr.msra.gmra.mxu1 %v584_v46 }
 0x22e   : > { %v658_v49 = vpop.f32.mrf.mxu1 }
 0x22f   : > { %1250 = vtanh.f32 %v658_v49 }
 0x235   : > { %v1251_v50 = vpop.eup %1250 }
 0x236   : > { %v660_v51 = vpop.f32.mrf.mxu1  ;;  %v663_v52 = vpack.c.bf16 %v1251_v50, %v1251_v50 }
 0x238   : > { %736 = vmatmul.bf16.vlgmr.msra.gmra.mxu2 %v663_v52 }
 0x2bb   : > { %v737_v53 = vpop.f32.mrf.mxu2 }
 0x2bc   : > { %741 = vst [vmem:[%s402_s18] sm:$0xff] %v737_v53 }
 0x2c3   : > { %v739_v54 = vpop.f32.mrf.mxu2 }
 0x2c4 PF: > { %s1991_s6 = sld [smem:[#allocation21_spill]]  ;;  %s755_s30 = sshll.u32 %s402_s18, 4  ;;  %s756_s30 = int_to_ptr.vmem [resolvable:$true] %s755_s30 }
 0x2c5   : > { %s1993_s17 = sld [smem:[#allocation35_spill]]  ;;  %s743_s7 = scalar_lea.sflag [#allocation5], %s400_s22 }
 0x2ca   : > { %s1043_s21 = sshll.u32 %s1991_s6, 3 }
 0x2cb   : > { %s753_s24 = scalar_lea.hbm %s1993_s17, %s1043_s21  ;;  %s1422_s23 = scalar_lea.hbm %s1993_s17, 16 }
 0x2cc   : > { %s757_s20 = sshll.u32 %s753_s24, 4  ;;  %s758_s20 = int_to_ptr.hbm [resolvable:$true] %s757_s20 }
 0x2cd   : > { %s1416_s0 = sshra.s32 %s758_s20, 4  ;;  %s1417_s0 = int_to_ptr.hbm [resolvable:$true] %s1416_s0 }
 0x2ce   : > { %s1418_s9 = scalar_lea.hbm %s1417_s0, 8  ;;  %p1423_p8 = scmp.lt.s32.totalorder %s1417_s0, %s1993_s17 }
 0x2cf   : > { %p1419_p12 = scmp.ne.s32.totalorder %s1417_s0, %s1418_s9  ;;  %p1424_p11 = scmp.lt.s32.totalorder %s1422_s23, %s1418_s9 }
 0x2d1   : > { %p1420_p0 = pnand %p1419_p12, %p1782_p9  ;;  %p1425_p13 = por %p1424_p11, %p1423_p8 }
 0x2d3   : > { %p1421_p7 = pneg %p1420_p0 }
 0x2d5   : > { %p1426_p3 = pnand %p1425_p13, %p1421_p7 }
 0x2d7   : > { %1429 = shalt.err (!%p1426_p3)
}
 0x2d8   : > { %1095 = dma.vmem_to_hbm [thread:$0]  (%p1782_p9), %s756_s30, 128, %s758_s20, %s743_s7  }
 0x2d9 PF: > { %s1994_s22 = sld [smem:[#allocation18_spill]]  ;;  %p1125_p5 = scmp.ge.s32.totalorder %s1560_s14, 2 }
 0x2db   : > { %p1115_p2 = pnand %p1125_p5, %p1793_p6 }
 0x2dd   : > { %p1116_p10 = pneg %p1115_p2 }
 0x2df   : > { %s769_s18 = sand.u32 1, %s1994_s22  }
 0x2e0   : > { %s770_s10 = scalar_lea.sflag [#allocation5], %s769_s18 }
 0x2e1   : > { %1503 = dma.done.wait (%p1116_p10), %s770_s10, 128  }
 0x2e2   : > { %1505 = vsyncadd (%p1116_p10), %s770_s10, 4294967168  ;;  %s27_s14 = sadd.s32 1, %s1560_s14   ;;  %s1997_s11 = sld [smem:[#allocation19_spill]] }
 0x2e3   : > { %p1889_p4 = scmp.ge.s32.totalorder %s27_s14, 6   ;;  %s1998_s26 = sld [smem:[#allocation27_spill]] }
 0x2e4   : > { %s1999_s6 = sld [smem:[#allocation25_spill]]  ;;  %s2005_s24 = smov %s1512_s25 }
 0x2e5   : > { %s2000_s21 = sld [smem:[#allocation20_spill]]  ;;  %s2007_s27 = smov %s1524_s28 }
 0x2e6   : > { %s2001_s9 = sld [smem:[#allocation26_spill]]  ;;  %s2008_s28 = smov %s1528_s29 }
 0x2e7   : > { %s2002_s5 = sld [smem:[#allocation22_spill]]  ;;  %s2010_s30 = smov %s1536_s8 }
 0x2e8   : > { %s2003_s20 = sld [smem:[#allocation23_spill]]  ;;  %s2006_s25 = smov %s1997_s11 }
 0x2e9   : > { %s2004_s13 = sld [smem:[#allocation24_spill]]  ;;  %s2012_s10 = smov %s1552_s12 }
 0x2ea   : > { %s2009_s29 = smov %s1999_s6  ;;  %26 = sbr.rel (!%p1889_p4) target bundleno = 20 (0x14), region = 126 }
 0x2eb   : > { %s2011_s8 = smov %s2000_s21 }
 0x2ed   : > { %s2013_s11 = smov %s2002_s5 }
 0x2ee   : > { %s2014_s12 = smov %s2003_s20 }
 0x2ef   :  { %776 = vsyncpa [#allocation4], 1 }
 0x2f0   :  { %778 = vsyncpa [#allocation4 + $0x1], 1 }
 0x2f1   :  { %779 = vsyncpa [#allocation7], 1 }
 0x2f2   :  { %781 = vsyncpa [#allocation7 + $0x1], 1 }
 0x2f3   :  { %782 = vsyncpa [#allocation10], 1 }
 0x2f4   :  { %783 = vsyncpa [#allocation5], 1 }
 0x2f5   :  { %785 = vsyncpa [#allocation5 + $0x1], 1 }

</bundles_post_ra>
